<compile_context>
chip_gen: v5e
topology: v5e:2x2
jax: 0.10.0
libtpu: 0.0.40
codegen_flags: <defaults>
</compile_context>

<pallas_src>
import functools

import numpy as np
import jax
import jax.numpy as jnp
from jax.experimental import pallas as pl
from jax.experimental.pallas import tpu as pltpu


_VMEM_BUDGET = 48 * 1024 * 1024   # pipeline-buffer budget (leaves headroom on v7x's 64 MiB)


def _round_up(x, m):
    return ((x + m - 1) // m) * m


def _nms_kernel(rel_ref, rep_ref, top_ref, bot_ref, mask_ref, *,
                rel_thr, rep_thr, valid_h, valid_w, halo_rows):
    rep = rep_ref[...]                       # (TH, WB) row tile, WB = round_up(W, 128)
    TH, WB = rep.shape
    neg_inf = jnp.asarray(-jnp.inf, rep.dtype)

    i = pl.program_id(0)
    n = pl.num_programs(0)

    # Cheap boundary index vectors (no full (TH, WB) iotas).
    row1 = jax.lax.broadcasted_iota(jnp.int32, (TH, 1), 0)
    col1 = jax.lax.broadcasted_iota(jnp.int32, (1, WB), 1)

    # Rows past the true image height exist only as block padding of the last
    # tile.  Force them to -inf so they (a) never become keypoints and (b) never
    # beat the last valid row in the vertical max (also scrubs NaN garbage).
    if valid_h % TH != 0:
        rep = jnp.where(row1 < valid_h - i * TH, rep, neg_inf)

    # 1-row vertical halos: last row of the tile above / first row of the tile
    # below; -inf at the image top/bottom == MaxPool2d(k=3,s=1,p=1) padding.
    top_row = jnp.where(i == 0, neg_inf, top_ref[halo_rows - 1:halo_rows, :])   # (1, WB)
    bot_row = jnp.where(i == n - 1, neg_inf, bot_ref[0:1, :])                   # (1, WB)

    # Separable 3x3 max filter: vertical 3-max, then horizontal 3-max (4 rolls).
    # TODO(synk): verify via pl.lower_as_mlir that shift=TH-1 / WB-1 lowers to a
    # single minimal sublane/lane rotate rather than a long shuffle chain (perf only).
    up = jnp.where(row1 == 0, top_row, pltpu.roll(rep, shift=1, axis=0))
    down = jnp.where(row1 == TH - 1, bot_row, pltpu.roll(rep, shift=TH - 1, axis=0))
    vmax = jnp.maximum(rep, jnp.maximum(up, down))

    # Horizontal: wrap-around at col 0 and the (block-padding) column right of
    # the true image edge (col valid_w-1) are both forced to -inf.  Garbage in
    # padding columns >= valid_w stays column-local and those outputs are
    # dropped by the partial output-block store.
    left = jnp.where(col1 == 0, neg_inf, pltpu.roll(vmax, shift=1, axis=1))
    right = jnp.where(col1 >= valid_w - 1, neg_inf, pltpu.roll(vmax, shift=WB - 1, axis=1))
    pooled = jnp.maximum(vmax, jnp.maximum(left, right))

    rel = rel_ref[...]
    keep = (rep == pooled) & (rep >= rep_thr) & (rel >= rel_thr)
    mask_ref[...] = keep.astype(jnp.int8)


def _choose_tile_rows(H, W, tile_rows, itemsize):
    """Pick a tile height (multiple of 32) that fits the VMEM budget and feeds 2 TCs."""
    WB = _round_up(W, 128)
    # Double-buffered pipeline VMEM per tile row: rel+rep inputs + int8 output.
    per_row = (4 * itemsize + 2) * WB
    th_cap = max(32, (_VMEM_BUDGET // per_row) // 32 * 32)
    th = min(_round_up(max(int(tile_rows), 32), 32), th_cap)
    if H > 64:
        # Keep >= 2 grid steps so both v7x TensorCores get work ("parallel" axis).
        th = min(th, _round_up((H + 1) // 2, 32))
    return max(32, min(th, _round_up(H, 32)))


def nms_mask(reliability, repeatability, rel_thr=0.7, rep_thr=0.7, tile_rows=512):
    """reliability, repeatability: (1, 1, H, W) float32/bfloat16 (NCHW).

    Returns the (H, W) int8 keypoint mask (1 where a keypoint is detected).
    """
    rel2d = reliability[0, 0]
    rep2d = repeatability[0, 0]
    if rep2d.dtype != rel2d.dtype or rep2d.dtype not in (jnp.float32, jnp.bfloat16):
        rel2d = rel2d.astype(jnp.float32)
        rep2d = rep2d.astype(jnp.float32)
    H, W = rep2d.shape
    itemsize = jnp.dtype(rep2d.dtype).itemsize

    WB = _round_up(W, 128)                    # lane-aligned block width (block padding only,
    TH = _choose_tile_rows(H, W, tile_rows, itemsize)   # never materialized in HBM)
    assert TH % 32 == 0
    num_tiles = -(-H // TH)

    halo_rows = 8 if itemsize == 4 else 16    # min sublane tile for the input dtype
    tb = TH // halo_rows
    last_halo = -(-H // halo_rows) - 1

    kernel = functools.partial(
        _nms_kernel, rel_thr=float(rel_thr), rep_thr=float(rep_thr),
        valid_h=H, valid_w=W, halo_rows=halo_rows)

    # Pipeline VMEM: double-buffered (rel, rep) tiles + 2 halo blocks + int8 out.
    est_vmem = 2 * (2 * TH * WB * itemsize + 2 * halo_rows * WB * itemsize + TH * WB)
    vmem_limit = int(min(100 * 2 ** 20, max(32 * 2 ** 20, est_vmem + (4 << 20))))

    return pl.pallas_call(
        kernel,
        out_shape=jax.ShapeDtypeStruct((H, W), jnp.int8),
        grid=(num_tiles,),
        in_specs=[
            pl.BlockSpec((TH, WB), lambda i: (i, 0)),     # reliability row tile
            pl.BlockSpec((TH, WB), lambda i: (i, 0)),     # repeatability row tile
            # Halo blocks of repeatability just above / below the tile
            # (clamped at the image edge; kernel overrides with -inf there).
            pl.BlockSpec((halo_rows, WB), lambda i: (jnp.maximum(i * tb - 1, 0), 0)),
            pl.BlockSpec((halo_rows, WB), lambda i: (jnp.minimum((i + 1) * tb, last_halo), 0)),
        ],
        out_specs=pl.BlockSpec((TH, WB), lambda i: (i, 0)),
        compiler_params=pltpu.CompilerParams(
            dimension_semantics=("parallel",),
            vmem_limit_bytes=vmem_limit,
        ),
    )(rel2d, rep2d, rep2d, rep2d)


def non_max_suppression(reliability_list, repeatability_list, rel_thr=0.7, rep_thr=0.7,
                        tile_rows=512, max_keypoints=None):
    """Mirrors NonMaxSuppression.forward: returns (2, N) = (y, x) keypoint coords."""
    assert len(reliability_list) == len(repeatability_list) == 1
    mask = nms_mask(reliability_list[0], repeatability_list[0], rel_thr, rep_thr, tile_rows)
    # TODO(synk): dynamic-shape .nonzero() has no static-shape Pallas equivalent; pass
    # max_keypoints= for a jit-friendly static bound (padded with -1), else match PyTorch.
    if max_keypoints is None:
        ys, xs = jnp.nonzero(mask)
    else:
        ys, xs = jnp.nonzero(mask, size=int(max_keypoints), fill_value=-1)
    return jnp.stack([ys, xs], axis=0)   # N=C=1, so rows 0,1 of nonzero().t() are all zero


def _reference_numpy(reliability, repeatability, rel_thr=0.7, rep_thr=0.7):
    rep2 = np.asarray(repeatability[0, 0], dtype=np.float32)
    rel2 = np.asarray(reliability[0, 0], dtype=np.float32)
    H, W = rep2.shape
    padded = np.full((H + 2, W + 2), -np.inf, dtype=np.float32)
    padded[1:-1, 1:-1] = rep2
    pooled = np.max(
        np.stack([padded[dy:dy + H, dx:dx + W] for dy in range(3) for dx in range(3)]),
        axis=0,
    )
    maxima = (rep2 == pooled) & (rep2 >= np.float32(rep_thr)) & (rel2 >= np.float32(rel_thr))
    ys, xs = np.nonzero(maxima)
    return np.stack([ys, xs], axis=0)


if __name__ == "__main__":
    key = jax.random.PRNGKey(0)
    ks = jax.random.split(key, 6)

    def _run_case(kr, kp, H, W, tile_rows):
        rel = jax.random.uniform(kr, (1, 1, H, W), dtype=jnp.float32)
        rep = jax.random.uniform(kp, (1, 1, H, W), dtype=jnp.float32)
        out = jax.block_until_ready(
            non_max_suppression([rel], [rep], 0.7, 0.7, tile_rows=tile_rows))
        ref = _reference_numpy(np.asarray(rel), np.asarray(rep), 0.7, 0.7)
        assert out.shape == ref.shape, (H, W, out.shape, ref.shape)
        assert np.array_equal(np.asarray(out), ref), f"Pallas NMS mismatch at H={H}, W={W}"

    _run_case(ks[0], ks[1], 16, 16, 512)     # single tile; ragged H and W
    _run_case(ks[2], ks[3], 80, 200, 32)     # multi-tile; ragged last tile; W % 128 != 0
    _run_case(ks[4], ks[5], 64, 256, 32)     # aligned H and W; 2 parallel grid steps

    print("KERNEL_OK")
</pallas_src>

<mosaic_0001>
module attributes {stable_mosaic.version = 11 : i64} {
  func.func @_nms_kernel(%arg0: i32, %arg1: memref<32x128xf32, #tpu.memory_space<vmem>>, %arg2: memref<32x128xf32, #tpu.memory_space<vmem>>, %arg3: memref<8x128xf32, #tpu.memory_space<vmem>>, %arg4: memref<8x128xf32, #tpu.memory_space<vmem>>, %arg5: memref<32x128xi8, #tpu.memory_space<vmem>>) attributes {dimension_semantics = [#tpu.dimension_semantics<parallel>], iteration_bounds = array<i64: 1>, scalar_prefetch = 0 : i64, scratch_operands = 0 : i64, tpu.core_type = #tpu.core_type<tc>, window_params = [{transform_indices = @transform_0, window_bounds = array<i64: 32, 128>}, {transform_indices = @transform_1, window_bounds = array<i64: 32, 128>}, {transform_indices = @transform_2, window_bounds = array<i64: 8, 128>}, {transform_indices = @transform_3, window_bounds = array<i64: 8, 128>}, {transform_indices = @transform_4, window_bounds = array<i64: 32, 128>}]} {
    %c0 = arith.constant 0 : index
    %c0_0 = arith.constant 0 : index
    %0 = vector.load %arg2[%c0, %c0_0] : memref<32x128xf32, #tpu.memory_space<vmem>>, vector<32x128xf32>
    %1 = tpu.iota {dimensions = array<i32: 0>} : vector<32x1xi32>
    %2 = tpu.iota {dimensions = array<i32: 1>} : vector<1x128xi32>
    %c32_i32 = arith.constant 32 : i32
    %3 = arith.muli %arg0, %c32_i32 : i32
    %c16_i32 = arith.constant 16 : i32
    %4 = arith.subi %c16_i32, %3 : i32
    %5 = vector.broadcast %4 : i32 to vector<32x1xi32>
    %6 = arith.cmpi slt, %1, %5 : vector<32x1xi32>
    %cst = arith.constant 0xFF800000 : f32
    %7 = vector.shape_cast %6 : vector<32x1xi1> to vector<32x1xi1>
    %8 = vector.broadcast %7 : vector<32x1xi1> to vector<32x128xi1>
    %9 = vector.broadcast %cst : f32 to vector<32x128xf32>
    %10 = arith.select %8, %0, %9 : vector<32x128xi1>, vector<32x128xf32>
    %c0_i32 = arith.constant 0 : i32
    %11 = arith.cmpi eq, %arg0, %c0_i32 : i32
    %c7 = arith.constant 7 : index
    %c0_1 = arith.constant 0 : index
    %12 = vector.load %arg3[%c7, %c0_1] : memref<8x128xf32, #tpu.memory_space<vmem>>, vector<1x128xf32>
    %cst_2 = arith.constant 0xFF800000 : f32
    %13 = vector.broadcast %cst_2 : f32 to vector<1x128xf32>
    %14 = arith.select %11, %13, %12 : vector<1x128xf32>
    %c0_i32_3 = arith.constant 0 : i32
    %15 = arith.cmpi eq, %arg0, %c0_i32_3 : i32
    %c0_4 = arith.constant 0 : index
    %c0_5 = arith.constant 0 : index
    %16 = vector.load %arg4[%c0_4, %c0_5] : memref<8x128xf32, #tpu.memory_space<vmem>>, vector<1x128xf32>
    %cst_6 = arith.constant 0xFF800000 : f32
    %17 = vector.broadcast %cst_6 : f32 to vector<1x128xf32>
    %18 = arith.select %15, %17, %16 : vector<1x128xf32>
    %c0_i32_7 = arith.constant 0 : i32
    %19 = vector.broadcast %c0_i32_7 : i32 to vector<32x1xi32>
    %20 = arith.cmpi eq, %1, %19 : vector<32x1xi32>
    %c1_i32 = arith.constant 1 : i32
    %21 = tpu.dynamic_rotate %10 by %c1_i32 dim 0 : vector<32x128xf32>, i32 -> vector<32x128xf32>
    %22 = vector.shape_cast %20 : vector<32x1xi1> to vector<32x1xi1>
    %23 = vector.broadcast %22 : vector<32x1xi1> to vector<32x128xi1>
    %24 = vector.shape_cast %14 : vector<1x128xf32> to vector<1x128xf32>
    %25 = vector.broadcast %24 : vector<1x128xf32> to vector<32x128xf32>
    %26 = arith.select %23, %25, %21 : vector<32x128xi1>, vector<32x128xf32>
    %c31_i32 = arith.constant 31 : i32
    %27 = vector.broadcast %c31_i32 : i32 to vector<32x1xi32>
    %28 = arith.cmpi eq, %1, %27 : vector<32x1xi32>
    %c31_i32_8 = arith.constant 31 : i32
    %29 = tpu.dynamic_rotate %10 by %c31_i32_8 dim 0 : vector<32x128xf32>, i32 -> vector<32x128xf32>
    %30 = vector.shape_cast %28 : vector<32x1xi1> to vector<32x1xi1>
    %31 = vector.broadcast %30 : vector<32x1xi1> to vector<32x128xi1>
    %32 = vector.shape_cast %18 : vector<1x128xf32> to vector<1x128xf32>
    %33 = vector.broadcast %32 : vector<1x128xf32> to vector<32x128xf32>
    %34 = arith.select %31, %33, %29 : vector<32x128xi1>, vector<32x128xf32>
    %35 = arith.maximumf %26, %34 : vector<32x128xf32>
    %36 = arith.maximumf %10, %35 : vector<32x128xf32>
    %c0_i32_9 = arith.constant 0 : i32
    %37 = vector.broadcast %c0_i32_9 : i32 to vector<1x128xi32>
    %38 = arith.cmpi eq, %2, %37 : vector<1x128xi32>
    %c1_i32_10 = arith.constant 1 : i32
    %39 = tpu.dynamic_rotate %36 by %c1_i32_10 dim 1 : vector<32x128xf32>, i32 -> vector<32x128xf32>
    %cst_11 = arith.constant 0xFF800000 : f32
    %40 = vector.shape_cast %38 : vector<1x128xi1> to vector<1x128xi1>
    %41 = vector.broadcast %40 : vector<1x128xi1> to vector<32x128xi1>
    %42 = vector.broadcast %cst_11 : f32 to vector<32x128xf32>
    %43 = arith.select %41, %42, %39 : vector<32x128xi1>, vector<32x128xf32>
    %c15_i32 = arith.constant 15 : i32
    %44 = vector.broadcast %c15_i32 : i32 to vector<1x128xi32>
    %45 = arith.cmpi sge, %2, %44 : vector<1x128xi32>
    %c127_i32 = arith.constant 127 : i32
    %46 = tpu.dynamic_rotate %36 by %c127_i32 dim 1 : vector<32x128xf32>, i32 -> vector<32x128xf32>
    %cst_12 = arith.constant 0xFF800000 : f32
    %47 = vector.shape_cast %45 : vector<1x128xi1> to vector<1x128xi1>
    %48 = vector.broadcast %47 : vector<1x128xi1> to vector<32x128xi1>
    %49 = vector.broadcast %cst_12 : f32 to vector<32x128xf32>
    %50 = arith.select %48, %49, %46 : vector<32x128xi1>, vector<32x128xf32>
    %51 = arith.maximumf %43, %50 : vector<32x128xf32>
    %52 = arith.maximumf %36, %51 : vector<32x128xf32>
    %c0_13 = arith.constant 0 : index
    %c0_14 = arith.constant 0 : index
    %53 = vector.load %arg1[%c0_13, %c0_14] : memref<32x128xf32, #tpu.memory_space<vmem>>, vector<32x128xf32>
    %54 = arith.cmpf oeq, %10, %52 : vector<32x128xf32>
    %cst_15 = arith.constant 0.699999988 : f32
    %55 = vector.broadcast %cst_15 : f32 to vector<32x128xf32>
    %56 = arith.cmpf oge, %10, %55 : vector<32x128xf32>
    %57 = arith.andi %54, %56 : vector<32x128xi1>
    %cst_16 = arith.constant 0.699999988 : f32
    %58 = vector.broadcast %cst_16 : f32 to vector<32x128xf32>
    %59 = arith.cmpf oge, %53, %58 : vector<32x128xf32>
    %60 = arith.andi %57, %59 : vector<32x128xi1>
    %61 = arith.extui %60 : vector<32x128xi1> to vector<32x128xi8>
    %c0_17 = arith.constant 0 : index
    %c0_18 = arith.constant 0 : index
    %62 = vector.load %arg5[%c0_17, %c0_18] : memref<32x128xi8, #tpu.memory_space<vmem>>, vector<32x128xi8>
    tpu.vector_store %arg5[%c0_17, %c0_18], %61 {strides = array<i32>} : memref<32x128xi8, #tpu.memory_space<vmem>>, vector<32x128xi8>,
    return
  }
  func.func @transform_0(%arg0: i32) -> (i32, i32) {
    %c0_i32 = arith.constant 0 : i32
    %c0_i32_0 = arith.constant 0 : i32
    return %arg0, %c0_i32 : i32, i32
  }
  func.func @transform_1(%arg0: i32) -> (i32, i32) {
    %c0_i32 = arith.constant 0 : i32
    %c0_i32_0 = arith.constant 0 : i32
    return %arg0, %c0_i32 : i32, i32
  }
  func.func @transform_2(%arg0: i32) -> (i32, i32) {
    %c4_i32 = arith.constant 4 : i32
    %0 = arith.muli %arg0, %c4_i32 : i32
    %c1_i32 = arith.constant 1 : i32
    %1 = arith.subi %0, %c1_i32 : i32
    %c0_i32 = arith.constant 0 : i32
    %2 = arith.maxsi %1, %c0_i32 : i32
    %c0_i32_0 = arith.constant 0 : i32
    %c0_i32_1 = arith.constant 0 : i32
    return %2, %c0_i32_0 : i32, i32
  }
  func.func @transform_3(%arg0: i32) -> (i32, i32) {
    %c1_i32 = arith.constant 1 : i32
    %0 = arith.addi %arg0, %c1_i32 : i32
    %c4_i32 = arith.constant 4 : i32
    %1 = arith.muli %0, %c4_i32 : i32
    %c1_i32_0 = arith.constant 1 : i32
    %2 = arith.minsi %1, %c1_i32_0 : i32
    %c0_i32 = arith.constant 0 : i32
    %c0_i32_1 = arith.constant 0 : i32
    return %2, %c0_i32 : i32, i32
  }
  func.func @transform_4(%arg0: i32) -> (i32, i32) {
    %c0_i32 = arith.constant 0 : i32
    %c0_i32_0 = arith.constant 0 : i32
    return %arg0, %c0_i32 : i32, i32
  }
}

</mosaic_0001>

<bundles_post_ra>
// kernel: tpu_custom_call.1
= control target key start
LH: loop header
LB: loop body
LE: loop exit
PB: predicated region body
PF: predicated region fallthrough
CT: control target
= control target key end

     0   :  { %9 = vsyncpa [#allocation3], 0  ;;  %s505_s0 = inlined_call_operand.hbm [shape: f32[16,16], index: 0, kind: input, shape index: {}]   ;;  %s506_s1 = inlined_call_operand.hbm [shape: f32[16,16], index: 1, kind: input, shape index: {}]   ;;  %s507_s2 = inlined_call_operand.hbm [shape: f32[16,16], index: 2, kind: input, shape index: {}]   ;;  %s508_s3 = inlined_call_operand.hbm [shape: f32[16,16], index: 3, kind: input, shape index: {}]   ;;  %s509_s4 = inlined_call_operand.hbm [shape: s8[16,16], index: 4, kind: output, shape index: {}]  }
   0x1   :  { %10 = vsyncpa [#allocation6], 0 }
   0x2   :  { %11 = vsyncpa [#allocation9], 0 }
   0x3   :  { %12 = vsyncpa [#allocation4], 0 }
   0x4   :  { %16 = vsyncadd [#allocation3], 256  ;;  %s17_s17 = sshll.u32 %s505_s0, 4  ;;  %s451_s18 = smov [#allocation2]   ;;  %s18_s17 = int_to_ptr.hbm [resolvable:$true] %s17_s17 }
   0x5   :  { %s19_s19 = sshll.u32 %s451_s18, 4  ;;  %s452_s20 = smov 128   ;;  %s20_s19 = int_to_ptr.vmem [resolvable:$true] %s19_s19 }
   0x6   :  { %s453_s21 = smov 8  }
   0x7   :  { %25 = dma.hbm_to_vmem [thread:$0]  %s18_s17, 256, %s20_s19, [#allocation3], %s452_s20, %s452_s20, %s453_s21  }
   0x8   :  { %29 = vsyncadd [#allocation6], 256  ;;  %s30_s24 = sshll.u32 %s506_s1, 4  ;;  %s454_s25 = smov [#allocation5]   ;;  %s31_s24 = int_to_ptr.hbm [resolvable:$true] %s30_s24 }
   0x9   :  { %s32_s26 = sshll.u32 %s454_s25, 4  ;;  %s50_s0 = sshll.u32 %s507_s2, 4  ;;  %s33_s26 = int_to_ptr.vmem [resolvable:$true] %s32_s26  ;;  %s51_s0 = int_to_ptr.hbm [resolvable:$true] %s50_s0 }
   0xa   :  { %38 = dma.hbm_to_vmem [thread:$0]  %s31_s24, 256, %s33_s26, [#allocation6], %s452_s20, %s452_s20, %s453_s21  }
   0xb   :  { %s455_s29 = smov [#allocation7]   ;;  %s65_s7 = scalar_lea.hbm %s508_s3, 8 }
   0xc   :  { %s52_s30 = sshll.u32 %s455_s29, 4  ;;  %s67_s8 = sshll.u32 %s65_s7, 4  ;;  %s53_s30 = int_to_ptr.vmem [resolvable:$true] %s52_s30  ;;  %s68_s8 = int_to_ptr.hbm [resolvable:$true] %s67_s8 }
   0xd   :  { %55 = dma.hbm_to_vmem [thread:$0]  %s51_s0, 128, %s53_s30, [#allocation6]  }
   0xe   :  { %s456_s1 = smov [#allocation8]  }
   0xf   :  { %s69_s9 = sshll.u32 %s456_s1, 4  ;;  %s70_s9 = int_to_ptr.vmem [resolvable:$true] %s69_s9 }
  0x10   :  { %72 = dma.hbm_to_vmem [thread:$0]  %s68_s8, 128, %s70_s9, [#allocation9]  }
  0x11   :  { %443 = dma.done.wait [#allocation3], 512  }
  0x12   :  { %444 = vsyncadd [#allocation3], 4294966784 }
  0x13   :  { %445 = dma.done.wait [#allocation6], 640  }
  0x14   :  { %446 = vsyncadd [#allocation6], 4294966656 }
  0x15   :  { %447 = dma.done.wait [#allocation9], 128  }
  0x16   :  { %448 = vsyncadd [#allocation9], 4294967168  ;;  %v103_v0 = vlaneseq  ;;  %v457_v2 = vmov -inf   ;;  %v99_v4 = vld [vmem:[#allocation5] sm:$0xff]  ;;  %v100_v5 = vld [vmem:[#allocation5 + $0x8] sm:$0xff]  ;;  %s458_s2 = smov 127  }
  0x17   :  { %v143_v3 = vrot.slane %v457_v2, 7  ;;  %v158_v6 = vperm.slane %v457_v2, 0  ;;  %v141_v7 = vrot.slane %v99_v4, 7  ;;  %v167_v8 = vrot.slane %v99_v4, 1  ;;  %s459_s3 = smov 1   ;;  %v235_v28 = vld [vmem:[#allocation2] sm:$0xff] }
  0x18   :  { %v104_v1 = vshrl.u32 %v103_v0, 7  ;;  %v168_v9 = vrot.slane %v100_v5, 1  ;;  %v142_v10 = vrot.slane %v100_v5, 7  ;;  %v169_v11 = vrot.slane %v457_v2, 1  ;;  %v236_v33 = vld [vmem:[#allocation2 + $0x8] sm:$0xff] }
  0x19   :  { %v109_v21 = vand.u32 127, %v103_v0  ;;  %vm243_vm5 = vcmp.ge.f32.partialorder %v99_v4, 0.7  ;;  %vm251_vm7 = vcmp.ge.f32.partialorder %v235_v28, 0.7  ;;  %vm460_vm11 = vmmov 0  }
  0x1a   :  { %vm145_vm0 = vcmp.lt.s32.totalorder %v104_v1, 1  ;;  %vm171_vm1 = vcmp.lt.s32.totalorder %v104_v1, 7  ;;  %vm137_vm2 = vcmp.eq.s32.totalorder %v104_v1, 0  ;;  %vm244_vm9 = vcmp.ge.f32.partialorder %v100_v5, 0.7  ;;  %vm260_vm12 = vmpackc.low %vm460_vm11, %vm460_vm11 }
  0x1b   :  { %v149_v12 = vsel %vm145_vm0, %v143_v3, %v141_v7  ;;  %v174_v13 = vsel %vm171_vm1, %v167_v8, %v168_v9  ;;  %v148_v16 = vsel %vm145_vm0, %v141_v7, %v142_v10  ;;  %v173_v17 = vsel %vm171_vm1, %v168_v9, %v169_v11 }
  0x1c   :  { %v159_v14 = vsel %vm137_vm2, %v158_v6, %v149_v12  ;;  %v190_v19 = vmax.f32 %v148_v16, %v173_v17  ;;  %vm212_vm3 = vcmp.ge.s32.totalorder %v109_v21, 15  ;;  %vm197_vm4 = vcmp.eq.s32.totalorder %v109_v21, 0 }
  0x1d   :  { %v189_v15 = vmax.f32 %v159_v14, %v174_v13  ;;  %vm252_vm10 = vcmp.ge.f32.partialorder %v236_v33, 0.7  ;;  %v461_v36 = vmov 0  }
  0x1e   :  { %v194_v20 = vmax.f32 %v100_v5, %v190_v19  ;;  %v262_v37 = vsel %vm260_vm12, 16711935, %v461_v36 }
  0x1f   :  { %v193_v18 = vmax.f32 %v99_v4, %v189_v15 }
  0x21   :  { %213 = vrot.lane.b32.xlu1 %v193_v18, %s458_s2  ;;  %198 = vrot.lane.b32.xlu0 %v193_v18, %s459_s3 }
  0x29   :  { %215 = vrot.lane.b32.xlu1 %v194_v20, %s458_s2  ;;  %200 = vrot.lane.b32.xlu0 %v194_v20, %s459_s3 }
  0x93   :  { %v214_v22 = vpop.permute.xlu1 %213  ;;  %v199_v23 = vpop.permute.xlu0 %198 }
  0x94   :  { %v223_v24 = vsel %vm212_vm3, -inf, %v214_v22  ;;  %v208_v25 = vsel %vm197_vm4, -inf, %v199_v23 }
  0x95   :  { %v227_v26 = vmax.f32 %v208_v25, %v223_v24 }
  0x97   :  { %v231_v27 = vmax.f32 %v193_v18, %v227_v26 }
  0x99   :  { %vm239_vm6 = vcmp.eq.f32.partialorder %v99_v4, %v231_v27 }
  0x9a   :  { %vm247_vm8 = vmand %vm239_vm6, %vm243_vm5 }
  0x9b   :  { %v216_v29 = vpop.permute.xlu1 %215  ;;  %v201_v30 = vpop.permute.xlu0 %200  ;;  %vm255_vm13 = vmand %vm247_vm8, %vm251_vm7 }
  0x9c   :  { %v224_v31 = vsel %vm212_vm3, -inf, %v216_v29  ;;  %v209_v32 = vsel %vm197_vm4, -inf, %v201_v30 }
  0x9d   :  { %v228_v34 = vmax.f32 %v209_v32, %v224_v31 }
  0x9f   :  { %v232_v35 = vmax.f32 %v194_v20, %v228_v34 }
  0xa1   :  { %vm240_vm14 = vcmp.eq.f32.partialorder %v100_v5, %v232_v35 }
  0xa2   :  { %vm248_vm15 = vmand %vm240_vm14, %vm244_vm9 }
  0xa3   :  { %vm256_vm0 = vmand %vm248_vm15, %vm252_vm10 }
  0xa4   :  { %vm259_vm1 = vmpackc.low %vm256_vm0, %vm255_vm13 }
  0xa5   :  { %v261_v38 = vsel %vm259_vm1, 16711935, %v461_v36 }
  0xa6   :  { %v263_v39 = vpack.c.b8 %v262_v37, %v261_v38 }
  0xa8   :  { %vm264_vm2 = vnez %v263_v39 }
  0xa9   :  { %v265_v40 = vsel %vm264_vm2, 16843009, %v461_v36 }
  0xaa   :  { %v266_v41 = vunpack.c.0.s8 %v265_v40  ;;  %v267_v42 = vunpack.c.1.s8 %v265_v40  ;;  %v268_v43 = vunpack.c.2.s8 %v265_v40  ;;  %v269_v44 = vunpack.c.3.s8 %v265_v40 }
  0xac   :  { %v270_v45 = vpack.c.b16 %v266_v41, %v266_v41  ;;  %v272_v46 = vpack.c.b16 %v267_v42, %v267_v42  ;;  %v274_v47 = vpack.c.b16 %v268_v43, %v268_v43  ;;  %v276_v48 = vpack.c.b16 %v269_v44, %v269_v44 }
  0xae   :  { %v271_v49 = vpack.c.b8 %v270_v45, %v270_v45  ;;  %v273_v50 = vpack.c.b8 %v272_v46, %v272_v46  ;;  %v275_v51 = vpack.c.b8 %v274_v47, %v274_v47  ;;  %v277_v52 = vpack.c.b8 %v276_v48, %v276_v48 }
  0xb0   :  { %278 = vst [vmem:[#allocation10] sm:$0x3] %v271_v49 }
  0xb1   :  { %279 = vst [vmem:[#allocation10 + $0x2] sm:$0x3] %v273_v50 }
  0xb2   :  { %280 = vst [vmem:[#allocation10 + $0x4] sm:$0x3] %v275_v51 }
  0xb3   :  { %281 = vst [vmem:[#allocation10 + $0x6] sm:$0x3] %v277_v52 }
  0xb4   :  { %285 = vsyncadd [#allocation4], 64  ;;  %s288_s12 = sshll.u32 %s509_s4, 4  ;;  %s462_s13 = smov [#allocation10]   ;;  %s289_s12 = int_to_ptr.hbm [resolvable:$true] %s288_s12 }
  0xb5   :  { %s286_s14 = sshll.u32 %s462_s13, 4  ;;  %s463_s15 = smov 32   ;;  %s287_s14 = int_to_ptr.vmem [resolvable:$true] %s286_s14 }
  0xb6   :  { %s464_s16 = smov 2  }
  0xb7   :  { %294 = dma.vmem_to_hbm [thread:$0]  %s287_s14, 64, %s289_s12, [#allocation4], %s463_s15, %s463_s15, %s464_s16  }
  0xb8   :  { %449 = dma.done.wait [#allocation4], 128  }
  0xb9   :  { %450 = vsyncadd [#allocation4], 4294967168 }
  0xba   :  { %299 = vsyncpa [#allocation3], 1 }
  0xbb   :  { %300 = vsyncpa [#allocation6], 1 }
  0xbc   :  { %301 = vsyncpa [#allocation9], 1 }
  0xbd   :  { %302 = vsyncpa [#allocation4], 1 }

</bundles_post_ra>
